<compile_context>
chip_gen: v6e
topology: v6e:2x2x1
jax: 0.10.0
libtpu: 0.0.40
codegen_flags: <defaults>
</compile_context>

<pallas_src>
import functools

import jax
import jax.numpy as jnp
from jax.experimental import pallas as pl
from jax.experimental.pallas import tpu as pltpu

EPS = 1e-5
NEG_SLOPE = 0.01  # nn.LeakyReLU default
PAD = 128         # lane-dense feature width


def _bn(h, gamma, beta, inv_b):
    # BatchNorm1d, training mode: per-feature stats over the batch axis.
    # Single-pass moments: var = E[h^2] - E[h]^2 (biased, like PyTorch norm).
    mu = jnp.sum(h, axis=0, keepdims=True) * inv_b
    ex2 = jnp.sum(h * h, axis=0, keepdims=True) * inv_b
    var = ex2 - mu * mu
    return (h - mu) * jax.lax.rsqrt(var + EPS) * gamma + beta


def _lrelu(h):
    return jnp.maximum(h, NEG_SLOPE * h)


def _main1(x, w1, b1, g1, be1, w2, b2, inv_b):
    # Linear(100,100) -> BN(100) -> LeakyReLU -> Linear(100,100)  (padded to 128)
    h = jnp.dot(x, w1, preferred_element_type=jnp.float32) + b1
    h = _lrelu(_bn(h, g1, be1, inv_b))
    return jnp.dot(h, w2, preferred_element_type=jnp.float32) + b2


def _inter_kernel(x_ref, w1_ref, b1_ref, g1_ref, be1_ref, w2_ref, b2_ref,
                  inter_ref, *, inv_b):
    inter_ref[...] = _main1(x_ref[...], w1_ref[...], b1_ref[...], g1_ref[...],
                            be1_ref[...], w2_ref[...], b2_ref[...], inv_b)


def _full_kernel(x_ref,
                 w1_ref, b1_ref, g1_ref, be1_ref,
                 w2_ref, b2_ref,
                 g2_ref, be2_ref,
                 w3_ref, b3_ref, g3_ref, be3_ref,
                 w4_ref, b4_ref,
                 out_ref, *, inv_b):
    inter = _main1(x_ref[...], w1_ref[...], b1_ref[...], g1_ref[...],
                   be1_ref[...], w2_ref[...], b2_ref[...], inv_b)
    # main2: BN(100) -> LeakyReLU -> Linear(100,32) -> BN(32) -> LeakyReLU
    #        -> Linear(32,1) -> Sigmoid   (all padded to 128 lanes)
    h = _lrelu(_bn(inter, g2_ref[...], be2_ref[...], inv_b))
    h = jnp.dot(h, w3_ref[...], preferred_element_type=jnp.float32) + b3_ref[...]
    h = _lrelu(_bn(h, g3_ref[...], be3_ref[...], inv_b))
    h = jnp.dot(h, w4_ref[...], preferred_element_type=jnp.float32) + b4_ref[...]
    out_ref[...] = 1.0 / (1.0 + jnp.exp(-h))  # exp on EUP; pad cols discarded


@functools.partial(jax.jit, static_argnames=("intermediate",))
def discriminator_forward(x, padded_params, intermediate=False):
    """x: (B, 100) f32.  Returns (B, 1) sigmoid output, or (B, 100) if intermediate."""
    B = x.shape[0]
    inv_b = 1.0 / B
    xp = jnp.pad(x, ((0, 0), (0, PAD - x.shape[1])))  # lane-dense (B, 128)
    vmem = pl.BlockSpec(memory_space=pltpu.MemorySpace.VMEM)
    p = padded_params

    if intermediate:
        args = (xp, p["w1"], p["b1"], p["g1"], p["be1"], p["w2"], p["b2"])
        inter = pl.pallas_call(
            functools.partial(_inter_kernel, inv_b=inv_b),
            out_shape=jax.ShapeDtypeStruct((B, PAD), jnp.float32),
            in_specs=[vmem] * len(args),
            out_specs=vmem,
        )(*args)
        return inter[:, :100]

    args = (xp,
            p["w1"], p["b1"], p["g1"], p["be1"],
            p["w2"], p["b2"],
            p["g2"], p["be2"],
            p["w3"], p["b3"], p["g3"], p["be3"],
            p["w4"], p["b4"])
    out = pl.pallas_call(
        functools.partial(_full_kernel, inv_b=inv_b),
        out_shape=jax.ShapeDtypeStruct((B, PAD), jnp.float32),
        in_specs=[vmem] * len(args),
        out_specs=vmem,
    )(*args)
    return out[:, :1]


def init_params(key):
    """Parameters in natural (PyTorch-shaped) layout; weights stored (in, out)."""
    ks = jax.random.split(key, 8)

    def lin(kw, kb, fan_in, fan_out):
        bound = 1.0 / jnp.sqrt(fan_in)
        w = jax.random.uniform(kw, (fan_in, fan_out), jnp.float32, -bound, bound)
        b = jax.random.uniform(kb, (1, fan_out), jnp.float32, -bound, bound)
        return w, b

    w1, b1 = lin(ks[0], ks[1], 100, 100)
    w2, b2 = lin(ks[2], ks[3], 100, 100)
    w3, b3 = lin(ks[4], ks[5], 100, 32)
    w4, b4 = lin(ks[6], ks[7], 32, 1)
    # BatchNorm affine params as PyTorch initializes them: gamma=1, beta=0.
    return dict(
        w1=w1, b1=b1, g1=jnp.ones((1, 100), jnp.float32), be1=jnp.zeros((1, 100), jnp.float32),
        w2=w2, b2=b2, g2=jnp.ones((1, 100), jnp.float32), be2=jnp.zeros((1, 100), jnp.float32),
        w3=w3, b3=b3, g3=jnp.ones((1, 32), jnp.float32), be3=jnp.zeros((1, 32), jnp.float32),
        w4=w4, b4=b4,
    )


def pad_params(p):
    """Zero-pad every parameter to 128 lanes (and 128 sublanes for weights)."""
    def pw(w):
        return jnp.pad(w, ((0, PAD - w.shape[0]), (0, PAD - w.shape[1])))

    def pv(v):
        return jnp.pad(v, ((0, 0), (0, PAD - v.shape[1])))

    return {k: (pw(v) if k.startswith("w") else pv(v)) for k, v in p.items()}


def _reference(x, p, intermediate=False):
    """Pure-JAX reference on the unpadded parameters."""
    B = x.shape[0]
    inv_b = 1.0 / B
    h = x @ p["w1"] + p["b1"]
    h = _lrelu(_bn(h, p["g1"], p["be1"], inv_b))
    inter = h @ p["w2"] + p["b2"]
    if intermediate:
        return inter
    h = _lrelu(_bn(inter, p["g2"], p["be2"], inv_b))
    h = h @ p["w3"] + p["b3"]
    h = _lrelu(_bn(h, p["g3"], p["be3"], inv_b))
    h = h @ p["w4"] + p["b4"]
    return 1.0 / (1.0 + jnp.exp(-h))


if __name__ == "__main__":
    key = jax.random.PRNGKey(0)
    kx, kp = jax.random.split(key)

    B = 8  # BatchNorm1d training-mode statistics need batch > 1
    x = jax.random.normal(kx, (B, 100), jnp.float32)
    params = init_params(kp)
    pparams = pad_params(params)

    out = jax.block_until_ready(discriminator_forward(x, pparams, intermediate=False))
    inter = jax.block_until_ready(discriminator_forward(x, pparams, intermediate=True))

    assert out.shape == (B, 1) and inter.shape == (B, 100)
    ref_out = _reference(x, params, intermediate=False)
    ref_inter = _reference(x, params, intermediate=True)
    assert jnp.allclose(out, ref_out, atol=1e-5, rtol=1e-5)
    assert jnp.allclose(inter, ref_inter, atol=1e-4, rtol=1e-4)

    print("KERNEL_OK")
</pallas_src>

<mosaic_0001>
module attributes {stable_mosaic.version = 11 : i64} {
  func.func @_full_kernel(%arg0: memref<8x128xf32, #tpu.memory_space<vmem>>, %arg1: memref<128x128xf32, #tpu.memory_space<vmem>>, %arg2: memref<1x128xf32, #tpu.memory_space<vmem>>, %arg3: memref<1x128xf32, #tpu.memory_space<vmem>>, %arg4: memref<1x128xf32, #tpu.memory_space<vmem>>, %arg5: memref<128x128xf32, #tpu.memory_space<vmem>>, %arg6: memref<1x128xf32, #tpu.memory_space<vmem>>, %arg7: memref<1x128xf32, #tpu.memory_space<vmem>>, %arg8: memref<1x128xf32, #tpu.memory_space<vmem>>, %arg9: memref<128x128xf32, #tpu.memory_space<vmem>>, %arg10: memref<1x128xf32, #tpu.memory_space<vmem>>, %arg11: memref<1x128xf32, #tpu.memory_space<vmem>>, %arg12: memref<1x128xf32, #tpu.memory_space<vmem>>, %arg13: memref<128x128xf32, #tpu.memory_space<vmem>>, %arg14: memref<1x128xf32, #tpu.memory_space<vmem>>, %arg15: memref<8x128xf32, #tpu.memory_space<vmem>>) attributes {dimension_semantics = [], scalar_prefetch = 0 : i64, scratch_operands = 0 : i64, tpu.core_type = #tpu.core_type<tc>} {
    %c0 = arith.constant 0 : index
    %c0_0 = arith.constant 0 : index
    %0 = vector.load %arg0[%c0, %c0_0] : memref<8x128xf32, #tpu.memory_space<vmem>>, vector<8x128xf32>
    %c0_1 = arith.constant 0 : index
    %c0_2 = arith.constant 0 : index
    %1 = vector.load %arg1[%c0_1, %c0_2] : memref<128x128xf32, #tpu.memory_space<vmem>>, vector<128x128xf32>
    %c0_3 = arith.constant 0 : index
    %c0_4 = arith.constant 0 : index
    %2 = vector.load %arg2[%c0_3, %c0_4] : memref<1x128xf32, #tpu.memory_space<vmem>>, vector<1x128xf32>
    %c0_5 = arith.constant 0 : index
    %c0_6 = arith.constant 0 : index
    %3 = vector.load %arg3[%c0_5, %c0_6] : memref<1x128xf32, #tpu.memory_space<vmem>>, vector<1x128xf32>
    %c0_7 = arith.constant 0 : index
    %c0_8 = arith.constant 0 : index
    %4 = vector.load %arg4[%c0_7, %c0_8] : memref<1x128xf32, #tpu.memory_space<vmem>>, vector<1x128xf32>
    %c0_9 = arith.constant 0 : index
    %c0_10 = arith.constant 0 : index
    %5 = vector.load %arg5[%c0_9, %c0_10] : memref<128x128xf32, #tpu.memory_space<vmem>>, vector<128x128xf32>
    %c0_11 = arith.constant 0 : index
    %c0_12 = arith.constant 0 : index
    %6 = vector.load %arg6[%c0_11, %c0_12] : memref<1x128xf32, #tpu.memory_space<vmem>>, vector<1x128xf32>
    %cst = arith.constant dense<0.000000e+00> : vector<8x128xf32>
    %7 = tpu.matmul %0, %1, %cst {dimension_numbers = #tpu.dot_dimension_numbers<[1], [0], [0], [1], [0, 0, 1, 1], [], []>} : vector<8x128xf32>, vector<128x128xf32>, vector<8x128xf32> -> vector<8x128xf32>
    %8 = vector.broadcast %2 : vector<1x128xf32> to vector<8x128xf32>
    %9 = arith.addf %7, %8 : vector<8x128xf32>
    %cst_13 = arith.constant dense<0.000000e+00> : vector<128xf32>
    %10 = vector.multi_reduction <add>, %9, %cst_13 [0] : vector<8x128xf32> to vector<128xf32>
    %11 = vector.shape_cast %10 : vector<128xf32> to vector<1x128xf32>
    %cst_14 = arith.constant 1.250000e-01 : f32
    %12 = vector.broadcast %cst_14 : f32 to vector<1x128xf32>
    %13 = arith.mulf %11, %12 : vector<1x128xf32>
    %14 = arith.mulf %9, %9 : vector<8x128xf32>
    %cst_15 = arith.constant dense<0.000000e+00> : vector<128xf32>
    %15 = vector.multi_reduction <add>, %14, %cst_15 [0] : vector<8x128xf32> to vector<128xf32>
    %16 = vector.shape_cast %15 : vector<128xf32> to vector<1x128xf32>
    %cst_16 = arith.constant 1.250000e-01 : f32
    %17 = vector.broadcast %cst_16 : f32 to vector<1x128xf32>
    %18 = arith.mulf %16, %17 : vector<1x128xf32>
    %19 = arith.mulf %13, %13 : vector<1x128xf32>
    %20 = arith.subf %18, %19 : vector<1x128xf32>
    %21 = vector.broadcast %13 : vector<1x128xf32> to vector<8x128xf32>
    %22 = arith.subf %9, %21 : vector<8x128xf32>
    %cst_17 = arith.constant 9.99999974E-6 : f32
    %23 = vector.broadcast %cst_17 : f32 to vector<1x128xf32>
    %24 = arith.addf %20, %23 : vector<1x128xf32>
    %25 = math.rsqrt %24 : vector<1x128xf32>
    %26 = vector.broadcast %25 : vector<1x128xf32> to vector<8x128xf32>
    %27 = arith.mulf %22, %26 : vector<8x128xf32>
    %28 = vector.broadcast %3 : vector<1x128xf32> to vector<8x128xf32>
    %29 = arith.mulf %27, %28 : vector<8x128xf32>
    %30 = vector.broadcast %4 : vector<1x128xf32> to vector<8x128xf32>
    %31 = arith.addf %29, %30 : vector<8x128xf32>
    %cst_18 = arith.constant 0.00999999977 : f32
    %32 = vector.broadcast %cst_18 : f32 to vector<8x128xf32>
    %33 = arith.mulf %32, %31 : vector<8x128xf32>
    %34 = arith.maximumf %31, %33 : vector<8x128xf32>
    %cst_19 = arith.constant dense<0.000000e+00> : vector<8x128xf32>
    %35 = tpu.matmul %34, %5, %cst_19 {dimension_numbers = #tpu.dot_dimension_numbers<[1], [0], [0], [1], [0, 0, 1, 1], [], []>} : vector<8x128xf32>, vector<128x128xf32>, vector<8x128xf32> -> vector<8x128xf32>
    %36 = vector.broadcast %6 : vector<1x128xf32> to vector<8x128xf32>
    %37 = arith.addf %35, %36 : vector<8x128xf32>
    %c0_20 = arith.constant 0 : index
    %c0_21 = arith.constant 0 : index
    %38 = vector.load %arg7[%c0_20, %c0_21] : memref<1x128xf32, #tpu.memory_space<vmem>>, vector<1x128xf32>
    %c0_22 = arith.constant 0 : index
    %c0_23 = arith.constant 0 : index
    %39 = vector.load %arg8[%c0_22, %c0_23] : memref<1x128xf32, #tpu.memory_space<vmem>>, vector<1x128xf32>
    %cst_24 = arith.constant dense<0.000000e+00> : vector<128xf32>
    %40 = vector.multi_reduction <add>, %37, %cst_24 [0] : vector<8x128xf32> to vector<128xf32>
    %41 = vector.shape_cast %40 : vector<128xf32> to vector<1x128xf32>
    %cst_25 = arith.constant 1.250000e-01 : f32
    %42 = vector.broadcast %cst_25 : f32 to vector<1x128xf32>
    %43 = arith.mulf %41, %42 : vector<1x128xf32>
    %44 = arith.mulf %37, %37 : vector<8x128xf32>
    %cst_26 = arith.constant dense<0.000000e+00> : vector<128xf32>
    %45 = vector.multi_reduction <add>, %44, %cst_26 [0] : vector<8x128xf32> to vector<128xf32>
    %46 = vector.shape_cast %45 : vector<128xf32> to vector<1x128xf32>
    %cst_27 = arith.constant 1.250000e-01 : f32
    %47 = vector.broadcast %cst_27 : f32 to vector<1x128xf32>
    %48 = arith.mulf %46, %47 : vector<1x128xf32>
    %49 = arith.mulf %43, %43 : vector<1x128xf32>
    %50 = arith.subf %48, %49 : vector<1x128xf32>
    %51 = vector.broadcast %43 : vector<1x128xf32> to vector<8x128xf32>
    %52 = arith.subf %37, %51 : vector<8x128xf32>
    %cst_28 = arith.constant 9.99999974E-6 : f32
    %53 = vector.broadcast %cst_28 : f32 to vector<1x128xf32>
    %54 = arith.addf %50, %53 : vector<1x128xf32>
    %55 = math.rsqrt %54 : vector<1x128xf32>
    %56 = vector.broadcast %55 : vector<1x128xf32> to vector<8x128xf32>
    %57 = arith.mulf %52, %56 : vector<8x128xf32>
    %58 = vector.broadcast %38 : vector<1x128xf32> to vector<8x128xf32>
    %59 = arith.mulf %57, %58 : vector<8x128xf32>
    %60 = vector.broadcast %39 : vector<1x128xf32> to vector<8x128xf32>
    %61 = arith.addf %59, %60 : vector<8x128xf32>
    %cst_29 = arith.constant 0.00999999977 : f32
    %62 = vector.broadcast %cst_29 : f32 to vector<8x128xf32>
    %63 = arith.mulf %62, %61 : vector<8x128xf32>
    %64 = arith.maximumf %61, %63 : vector<8x128xf32>
    %c0_30 = arith.constant 0 : index
    %c0_31 = arith.constant 0 : index
    %65 = vector.load %arg9[%c0_30, %c0_31] : memref<128x128xf32, #tpu.memory_space<vmem>>, vector<128x128xf32>
    %cst_32 = arith.constant dense<0.000000e+00> : vector<8x128xf32>
    %66 = tpu.matmul %64, %65, %cst_32 {dimension_numbers = #tpu.dot_dimension_numbers<[1], [0], [0], [1], [0, 0, 1, 1], [], []>} : vector<8x128xf32>, vector<128x128xf32>, vector<8x128xf32> -> vector<8x128xf32>
    %c0_33 = arith.constant 0 : index
    %c0_34 = arith.constant 0 : index
    %67 = vector.load %arg10[%c0_33, %c0_34] : memref<1x128xf32, #tpu.memory_space<vmem>>, vector<1x128xf32>
    %68 = vector.broadcast %67 : vector<1x128xf32> to vector<8x128xf32>
    %69 = arith.addf %66, %68 : vector<8x128xf32>
    %c0_35 = arith.constant 0 : index
    %c0_36 = arith.constant 0 : index
    %70 = vector.load %arg11[%c0_35, %c0_36] : memref<1x128xf32, #tpu.memory_space<vmem>>, vector<1x128xf32>
    %c0_37 = arith.constant 0 : index
    %c0_38 = arith.constant 0 : index
    %71 = vector.load %arg12[%c0_37, %c0_38] : memref<1x128xf32, #tpu.memory_space<vmem>>, vector<1x128xf32>
    %cst_39 = arith.constant dense<0.000000e+00> : vector<128xf32>
    %72 = vector.multi_reduction <add>, %69, %cst_39 [0] : vector<8x128xf32> to vector<128xf32>
    %73 = vector.shape_cast %72 : vector<128xf32> to vector<1x128xf32>
    %cst_40 = arith.constant 1.250000e-01 : f32
    %74 = vector.broadcast %cst_40 : f32 to vector<1x128xf32>
    %75 = arith.mulf %73, %74 : vector<1x128xf32>
    %76 = arith.mulf %69, %69 : vector<8x128xf32>
    %cst_41 = arith.constant dense<0.000000e+00> : vector<128xf32>
    %77 = vector.multi_reduction <add>, %76, %cst_41 [0] : vector<8x128xf32> to vector<128xf32>
    %78 = vector.shape_cast %77 : vector<128xf32> to vector<1x128xf32>
    %cst_42 = arith.constant 1.250000e-01 : f32
    %79 = vector.broadcast %cst_42 : f32 to vector<1x128xf32>
    %80 = arith.mulf %78, %79 : vector<1x128xf32>
    %81 = arith.mulf %75, %75 : vector<1x128xf32>
    %82 = arith.subf %80, %81 : vector<1x128xf32>
    %83 = vector.broadcast %75 : vector<1x128xf32> to vector<8x128xf32>
    %84 = arith.subf %69, %83 : vector<8x128xf32>
    %cst_43 = arith.constant 9.99999974E-6 : f32
    %85 = vector.broadcast %cst_43 : f32 to vector<1x128xf32>
    %86 = arith.addf %82, %85 : vector<1x128xf32>
    %87 = math.rsqrt %86 : vector<1x128xf32>
    %88 = vector.broadcast %87 : vector<1x128xf32> to vector<8x128xf32>
    %89 = arith.mulf %84, %88 : vector<8x128xf32>
    %90 = vector.broadcast %70 : vector<1x128xf32> to vector<8x128xf32>
    %91 = arith.mulf %89, %90 : vector<8x128xf32>
    %92 = vector.broadcast %71 : vector<1x128xf32> to vector<8x128xf32>
    %93 = arith.addf %91, %92 : vector<8x128xf32>
    %cst_44 = arith.constant 0.00999999977 : f32
    %94 = vector.broadcast %cst_44 : f32 to vector<8x128xf32>
    %95 = arith.mulf %94, %93 : vector<8x128xf32>
    %96 = arith.maximumf %93, %95 : vector<8x128xf32>
    %c0_45 = arith.constant 0 : index
    %c0_46 = arith.constant 0 : index
    %97 = vector.load %arg13[%c0_45, %c0_46] : memref<128x128xf32, #tpu.memory_space<vmem>>, vector<128x128xf32>
    %cst_47 = arith.constant dense<0.000000e+00> : vector<8x128xf32>
    %98 = tpu.matmul %96, %97, %cst_47 {dimension_numbers = #tpu.dot_dimension_numbers<[1], [0], [0], [1], [0, 0, 1, 1], [], []>} : vector<8x128xf32>, vector<128x128xf32>, vector<8x128xf32> -> vector<8x128xf32>
    %c0_48 = arith.constant 0 : index
    %c0_49 = arith.constant 0 : index
    %99 = vector.load %arg14[%c0_48, %c0_49] : memref<1x128xf32, #tpu.memory_space<vmem>>, vector<1x128xf32>
    %100 = vector.broadcast %99 : vector<1x128xf32> to vector<8x128xf32>
    %101 = arith.addf %98, %100 : vector<8x128xf32>
    %cst_50 = arith.constant 0.000000e+00 : f32
    %102 = vector.broadcast %cst_50 : f32 to vector<8x128xf32>
    %103 = arith.subf %102, %101 : vector<8x128xf32>
    %104 = math.exp %103 : vector<8x128xf32>
    %cst_51 = arith.constant 1.000000e+00 : f32
    %105 = vector.broadcast %cst_51 : f32 to vector<8x128xf32>
    %106 = arith.addf %105, %104 : vector<8x128xf32>
    %cst_52 = arith.constant 1.000000e+00 : f32
    %107 = vector.broadcast %cst_52 : f32 to vector<8x128xf32>
    %108 = arith.divf %107, %106 : vector<8x128xf32>
    %c0_53 = arith.constant 0 : index
    %c0_54 = arith.constant 0 : index
    %109 = vector.load %arg15[%c0_53, %c0_54] : memref<8x128xf32, #tpu.memory_space<vmem>>, vector<8x128xf32>
    tpu.vector_store %arg15[%c0_53, %c0_54], %108 {strides = array<i32>} : memref<8x128xf32, #tpu.memory_space<vmem>>, vector<8x128xf32>,
    return
  }
}

</mosaic_0001>

<bundles_post_ra>
// kernel: discriminator_forward.1
= control target key start
LH: loop header
LB: loop body
LE: loop exit
PB: predicated region body
PF: predicated region fallthrough
CT: control target
= control target key end

     0   :  { %20 = vsyncpa [#allocation3], 0  ;;  %s1151_s0 = inlined_call_operand.vmem [shape: f32[8,128], index: 0, kind: input, shape index: {}]   ;;  %s1152_s1 = inlined_call_operand.hbm [shape: f32[128,128], index: 1, kind: input, shape index: {}]   ;;  %s1153_s2 = inlined_call_operand.vmem [shape: f32[1,128], index: 2, kind: input, shape index: {}]   ;;  %s1154_s3 = inlined_call_operand.vmem [shape: f32[1,128], index: 3, kind: input, shape index: {}]   ;;  %s1155_s4 = inlined_call_operand.vmem [shape: f32[1,128], index: 4, kind: input, shape index: {}]   ;;  %s1156_s5 = inlined_call_operand.hbm [shape: f32[128,128], index: 5, kind: input, shape index: {}]   ;;  %s1157_s6 = inlined_call_operand.vmem [shape: f32[1,128], index: 6, kind: input, shape index: {}]   ;;  %s1158_s7 = inlined_call_operand.vmem [shape: f32[1,128], index: 7, kind: input, shape index: {}]   ;;  %s1159_s8 = inlined_call_operand.vmem [shape: f32[1,128], index: 8, kind: input, shape index: {}]   ;;  %s1160_s9 = inlined_call_operand.hbm [shape: f32[128,128], index: 9, kind: input, shape index: {}]   ;;  %s1161_s10 = inlined_call_operand.vmem [shape: f32[1,128], index: 10, kind: input, shape index: {}]   ;;  %s1162_s11 = inlined_call_operand.vmem [shape: f32[1,128], index: 11, kind: input, shape index: {}]   ;;  %s1163_s12 = inlined_call_operand.vmem [shape: f32[1,128], index: 12, kind: input, shape index: {}]   ;;  %s1164_s13 = inlined_call_operand.hbm [shape: f32[128,128], index: 13, kind: input, shape index: {}]   ;;  %s1165_s14 = inlined_call_operand.vmem [shape: f32[1,128], index: 14, kind: input, shape index: {}]   ;;  %s1166_s15 = inlined_call_operand.vmem [shape: f32[8,128], index: 15, kind: output, shape index: {}]  }
   0x1   :  { %21 = vsyncpa [#allocation5], 0 }
   0x2   :  { %22 = vsyncpa [#allocation8], 0  ;;  %s931_s18 = smov [#allocation4]   ;;  %s932_s20 = smov [#allocation2]  }
   0x3   :  { %s48_s19 = sshll.u32 %s931_s18, 4  ;;  %s30_s21 = sshll.u32 %s932_s20, 4  ;;  %s49_s19 = int_to_ptr.vmem [resolvable:$true] %s48_s19  ;;  %s31_s21 = int_to_ptr.vmem [resolvable:$true] %s30_s21 }
   0x4   :  { %s853_s22 = scalar_lea.vmem %s49_s19, 2048  ;;  %p858_p1 = scmp.lt.s32.totalorder %s49_s19, %s49_s19 }
   0x5   :  { %p854_p0 = scmp.ne.s32.totalorder %s49_s19, %s853_s22  ;;  %p859_p2 = scmp.lt.s32.totalorder %s853_s22, %s853_s22 }
   0x7   :  { %p860_p3 = por %p859_p2, %p858_p1 }
   0x9   :  { %p861_p4 = pnand %p860_p3, %p854_p0 }
   0xb   :  { %864 = shalt.err (!%p861_p4)
}
   0xc   :  { %s933_s23 = smov 128   ;;  %s934_s24 = smov 8  }
   0xd   :  { %54 = dma.hbm_to_vmem [thread:$0]  %s1156_s5, 2048, %s49_s19, [#allocation5], %s933_s23, %s933_s23, %s934_s24  }
   0xe   :  { %s873_s27 = scalar_lea.vmem %s31_s21, 2048  ;;  %p878_p6 = scmp.lt.s32.totalorder %s31_s21, %s31_s21 }
   0xf   :  { %p874_p5 = scmp.ne.s32.totalorder %s31_s21, %s873_s27  ;;  %p879_p7 = scmp.lt.s32.totalorder %s873_s27, %s873_s27 }
  0x11   :  { %p880_p8 = por %p879_p7, %p878_p6 }
  0x13   :  { %p881_p9 = pnand %p880_p8, %p874_p5 }
  0x15   :  { %884 = shalt.err (!%p881_p9)
}
  0x16   :  { %36 = dma.hbm_to_vmem [thread:$0]  %s1152_s1, 2048, %s31_s21, [#allocation3], %s933_s23, %s933_s23, %s934_s24  }
  0x17   :  { %s935_s30 = smov [#allocation6]   ;;  %s936_s17 = smov [#allocation7]  }
  0x18   :  { %s66_s16 = sshll.u32 %s935_s30, 4  ;;  %s84_s18 = sshll.u32 %s936_s17, 4  ;;  %s67_s16 = int_to_ptr.vmem [resolvable:$true] %s66_s16  ;;  %s85_s18 = int_to_ptr.vmem [resolvable:$true] %s84_s18 }
  0x19   :  { %s893_s5 = scalar_lea.vmem %s67_s16, 2048  ;;  %p898_p11 = scmp.lt.s32.totalorder %s67_s16, %s67_s16 }
  0x1a   :  { %p894_p10 = scmp.ne.s32.totalorder %s67_s16, %s893_s5  ;;  %p899_p12 = scmp.lt.s32.totalorder %s893_s5, %s893_s5 }
  0x1c   :  { %p900_p13 = por %p899_p12, %p898_p11 }
  0x1e   :  { %p901_p0 = pnand %p900_p13, %p894_p10 }
  0x20   :  { %904 = shalt.err (!%p901_p0)
}
  0x21   :  { %72 = dma.hbm_to_vmem [thread:$0]  %s1160_s9, 2048, %s67_s16, [#allocation5], %s933_s23, %s933_s23, %s934_s24  }
  0x22   :  { %s913_s1 = scalar_lea.vmem %s85_s18, 2048  ;;  %p918_p2 = scmp.lt.s32.totalorder %s85_s18, %s85_s18 }
  0x23   :  { %p914_p1 = scmp.ne.s32.totalorder %s85_s18, %s913_s1  ;;  %p919_p3 = scmp.lt.s32.totalorder %s913_s1, %s913_s1 }
  0x25   :  { %p920_p4 = por %p919_p3, %p918_p2 }
  0x27   :  { %p921_p5 = pnand %p920_p4, %p914_p1 }
  0x29   :  { %924 = shalt.err (!%p921_p5)
}
  0x2a   :  { %90 = dma.hbm_to_vmem [thread:$0]  %s1164_s13, 2048, %s85_s18, [#allocation8], %s933_s23, %s933_s23, %s934_s24  }
  0x2b   :  { %925 = dma.done.wait [#allocation3], 2048  }
  0x2c   :  { %926 = vsyncadd [#allocation3], 4294965248 }
  0x2d   :  { %927 = dma.done.wait [#allocation5], 4096  }
  0x2e   :  { %928 = vsyncadd [#allocation5], 4294963200 }
  0x2f   :  { %929 = dma.done.wait [#allocation8], 2048  }
  0x30   :  { %930 = vsyncadd [#allocation8], 4294965248  ;;  %v937_v0 = vmov 0.0   ;;  %vm938_vm0 = vmmov 0   ;;  %v121_v1 = vld [vmem:[#allocation2 + $0x78] sm:$0xff]  ;;  %v120_v2 = vld [vmem:[#allocation2 + $0x70] sm:$0xff] }
  0x31   :  { %687 = vmatprep.subr.mxu0 %v937_v0  ;;  %719 = vmatprep.mubr.msk.f32.mxu0 %vm938_vm0, %v937_v0  ;;  %v119_v3 = vld [vmem:[#allocation2 + $0x68] sm:$0xff]  ;;  %v118_v4 = vld [vmem:[#allocation2 + $0x60] sm:$0xff]  ;;  %v117_v5 = vld [vmem:[#allocation2 + $0x58] sm:$0xff] }
  0x32   :  { %722 = vmatprep.subr.mxu1 %v937_v0  ;;  %754 = vmatprep.mubr.msk.f32.mxu1 %vm938_vm0, %v937_v0  ;;  %v116_v6 = vld [vmem:[#allocation2 + $0x50] sm:$0xff]  ;;  %v115_v7 = vld [vmem:[#allocation2 + $0x48] sm:$0xff]  ;;  %v114_v8 = vld [vmem:[#allocation2 + $0x40] sm:$0xff] }
  0x33   :  { %688 = vmatpush3.msra.mxu0 %v121_v1  ;;  %v113_v9 = vld [vmem:[#allocation2 + $0x38] sm:$0xff]  ;;  %v112_v10 = vld [vmem:[#allocation2 + $0x30] sm:$0xff]  ;;  %v111_v11 = vld [vmem:[#allocation2 + $0x28] sm:$0xff] }
  0x34   :  { %689 = vmatprep.subr.mxu0 %v937_v0  ;;  %v110_v12 = vld [vmem:[#allocation2 + $0x20] sm:$0xff]  ;;  %v109_v13 = vld [vmem:[#allocation2 + $0x18] sm:$0xff]  ;;  %v108_v14 = vld [vmem:[#allocation2 + $0x10] sm:$0xff] }
  0x35   :  { %690 = vmatpush3.msra.mxu0 %v120_v2  ;;  %v107_v15 = vld [vmem:[#allocation2 + $0x8] sm:$0xff]  ;;  %v106_v16 = vld [vmem:[#allocation2] sm:$0xff]  ;;  %v140_v18 = vld [vmem:[#allocation4 + $0x78] sm:$0xff] }
  0x36   :  { %691 = vmatprep.subr.mxu0 %v937_v0  ;;  %v105_v17 = vld [vmem:[%s1151_s0] sm:$0xff]  ;;  %723 = vmatpush3.msra.mxu1 %v140_v18  ;;  %v139_v19 = vld [vmem:[#allocation4 + $0x70] sm:$0xff]  ;;  %v138_v20 = vld [vmem:[#allocation4 + $0x68] sm:$0xff] }
  0x37   :  { %692 = vmatpush3.msra.mxu0 %v119_v3  ;;  %724 = vmatprep.subr.mxu1 %v937_v0  ;;  %v137_v21 = vld [vmem:[#allocation4 + $0x60] sm:$0xff]  ;;  %v136_v22 = vld [vmem:[#allocation4 + $0x58] sm:$0xff]  ;;  %v135_v23 = vld [vmem:[#allocation4 + $0x50] sm:$0xff] }
  0x38   :  { %693 = vmatprep.subr.mxu0 %v937_v0  ;;  %725 = vmatpush3.msra.mxu1 %v139_v19  ;;  %v134_v24 = vld [vmem:[#allocation4 + $0x48] sm:$0xff]  ;;  %v133_v25 = vld [vmem:[#allocation4 + $0x40] sm:$0xff]  ;;  %v132_v26 = vld [vmem:[#allocation4 + $0x38] sm:$0xff] }
  0x39   :  { %694 = vmatpush3.msra.mxu0 %v118_v4  ;;  %726 = vmatprep.subr.mxu1 %v937_v0  ;;  %v131_v27 = vld [vmem:[#allocation4 + $0x30] sm:$0xff]  ;;  %v130_v28 = vld [vmem:[#allocation4 + $0x28] sm:$0xff]  ;;  %v129_v29 = vld [vmem:[#allocation4 + $0x20] sm:$0xff] }
  0x3a   :  { %695 = vmatprep.subr.mxu0 %v937_v0  ;;  %727 = vmatpush3.msra.mxu1 %v138_v20  ;;  %v128_v30 = vld [vmem:[#allocation4 + $0x18] sm:$0xff]  ;;  %v127_v31 = vld [vmem:[#allocation4 + $0x10] sm:$0xff]  ;;  %v126_v32 = vld [vmem:[#allocation4 + $0x8] sm:$0xff] }
  0x3b   :  { %696 = vmatpush3.msra.mxu0 %v117_v5  ;;  %728 = vmatprep.subr.mxu1 %v937_v0  ;;  %v125_v33 = vld [vmem:[#allocation4] sm:$0xff]  ;;  %v385_v2 = vld [vmem:[#allocation6 + $0x78] sm:$0xff]  ;;  %v384_v3 = vld [vmem:[#allocation6 + $0x70] sm:$0xff] }
  0x3c   :  { %697 = vmatprep.subr.mxu0 %v937_v0  ;;  %729 = vmatpush3.msra.mxu1 %v137_v21  ;;  %v609_v34 = vld [vmem:[%s1153_s2] ss:$0 sm:$0xff]  ;;  %v383_v4 = vld [vmem:[#allocation6 + $0x68] sm:$0xff] }
  0x3d   :  { %698 = vmatpush3.msra.mxu0 %v116_v6  ;;  %730 = vmatprep.subr.mxu1 %v937_v0  ;;  %v610_v58 = vld [vmem:[%s1154_s3] ss:$0 sm:$0xff]  ;;  %v381_v6 = vld [vmem:[#allocation6 + $0x58] sm:$0xff] }
  0x3e   :  { %699 = vmatprep.subr.mxu0 %v937_v0  ;;  %731 = vmatpush3.msra.mxu1 %v136_v22  ;;  %v611_v60 = vld [vmem:[%s1155_s4] ss:$0 sm:$0xff] }
  0x3f   :  { %700 = vmatpush3.msra.mxu0 %v115_v7  ;;  %732 = vmatprep.subr.mxu1 %v937_v0  ;;  %v382_v5 = vld [vmem:[#allocation6 + $0x60] sm:$0xff]  ;;  %v380_v7 = vld [vmem:[#allocation6 + $0x50] sm:$0xff] }
  0x40   :  { %701 = vmatprep.subr.mxu0 %v937_v0  ;;  %733 = vmatpush3.msra.mxu1 %v135_v23  ;;  %v612_v18 = vld [vmem:[%s1157_s6] ss:$0 sm:$0xff] }
  0x41   :  { %702 = vmatpush3.msra.mxu0 %v114_v8  ;;  %734 = vmatprep.subr.mxu1 %v937_v0  ;;  %v379_v8 = vld [vmem:[#allocation6 + $0x48] sm:$0xff] }
  0x42   :  { %703 = vmatprep.subr.mxu0 %v937_v0  ;;  %735 = vmatpush3.msra.mxu1 %v134_v24 }
  0x43   :  { %704 = vmatpush3.msra.mxu0 %v113_v9  ;;  %736 = vmatprep.subr.mxu1 %v937_v0  ;;  %v378_v9 = vld [vmem:[#allocation6 + $0x40] sm:$0xff] }
  0x44   :  { %705 = vmatprep.subr.mxu0 %v937_v0  ;;  %737 = vmatpush3.msra.mxu1 %v133_v25 }
  0x45   :  { %706 = vmatpush3.msra.mxu0 %v112_v10  ;;  %738 = vmatprep.subr.mxu1 %v937_v0  ;;  %v377_v10 = vld [vmem:[#allocation6 + $0x38] sm:$0xff] }
  0x46   :  { %707 = vmatprep.subr.mxu0 %v937_v0  ;;  %739 = vmatpush3.msra.mxu1 %v132_v26 }
  0x47   :  { %708 = vmatpush3.msra.mxu0 %v111_v11  ;;  %740 = vmatprep.subr.mxu1 %v937_v0  ;;  %v376_v11 = vld [vmem:[#allocation6 + $0x30] sm:$0xff] }
  0x48   :  { %709 = vmatprep.subr.mxu0 %v937_v0  ;;  %741 = vmatpush3.msra.mxu1 %v131_v27 }
  0x49   :  { %710 = vmatpush3.msra.mxu0 %v110_v12  ;;  %742 = vmatprep.subr.mxu1 %v937_v0  ;;  %v375_v12 = vld [vmem:[#allocation6 + $0x28] sm:$0xff] }
  0x4a   :  { %711 = vmatprep.subr.mxu0 %v937_v0  ;;  %743 = vmatpush3.msra.mxu1 %v130_v28 }
  0x4b   :  { %712 = vmatpush3.msra.mxu0 %v109_v13  ;;  %744 = vmatprep.subr.mxu1 %v937_v0  ;;  %v374_v13 = vld [vmem:[#allocation6 + $0x20] sm:$0xff] }
  0x4c   :  { %713 = vmatprep.subr.mxu0 %v937_v0  ;;  %745 = vmatpush3.msra.mxu1 %v129_v29 }
  0x4d   :  { %714 = vmatpush3.msra.mxu0 %v108_v14  ;;  %746 = vmatprep.subr.mxu1 %v937_v0  ;;  %v373_v14 = vld [vmem:[#allocation6 + $0x18] sm:$0xff] }
  0x4e   :  { %715 = vmatprep.subr.mxu0 %v937_v0  ;;  %747 = vmatpush3.msra.mxu1 %v128_v30 }
  0x4f   :  { %716 = vmatpush3.msra.mxu0 %v107_v15  ;;  %748 = vmatprep.subr.mxu1 %v937_v0  ;;  %v372_v15 = vld [vmem:[#allocation6 + $0x10] sm:$0xff] }
  0x50   :  { %717 = vmatprep.subr.mxu0 %v937_v0  ;;  %749 = vmatpush3.msra.mxu1 %v127_v31 }
  0x51   :  { %718 = vmatpush3.msra.mxu0 %v106_v16  ;;  %750 = vmatprep.subr.mxu1 %v937_v0  ;;  %v371_v16 = vld [vmem:[#allocation6 + $0x8] sm:$0xff] }
  0x52   :  { %720 = vmatmul.mubr.f32.vlgmr.msra.gmra.mxu0 %v105_v17  ;;  %757 = vmatprep.subr.mxu0 %v937_v0  ;;  %v370_v17 = vld [vmem:[#allocation6] sm:$0xff] }
  0x53   :  { %789 = vmatprep.mubr.msk.f32.mxu0 %vm938_vm0, %v937_v0  ;;  %751 = vmatpush3.msra.mxu1 %v126_v32 }
  0x54   :  { %752 = vmatprep.subr.mxu1 %v937_v0  ;;  %758 = vmatpush3.msra.mxu0 %v385_v2  ;;  %v615_v2 = vld [vmem:[%s1161_s10] ss:$0 sm:$0xff] }
  0x55   :  { %753 = vmatpush3.msra.mxu1 %v125_v33  ;;  %759 = vmatprep.subr.mxu0 %v937_v0 }
  0x56   :  { %792 = vmatprep.subr.mxu1 %v937_v0  ;;  %760 = vmatpush3.msra.mxu0 %v384_v3 }
  0x57   :  { %761 = vmatprep.subr.mxu0 %v937_v0 }
  0x58   :  { %762 = vmatpush3.msra.mxu0 %v383_v4 }
  0x59   :  { %763 = vmatprep.subr.mxu0 %v937_v0 }
  0x5a   :  { %764 = vmatpush3.msra.mxu0 %v382_v5 }
  0x5b   :  { %765 = vmatprep.subr.mxu0 %v937_v0 }
  0x5c   :  { %766 = vmatpush3.msra.mxu0 %v381_v6 }
  0x5d   :  { %767 = vmatprep.subr.mxu0 %v937_v0 }
  0x5e   :  { %768 = vmatpush3.msra.mxu0 %v380_v7 }
  0x5f   :  { %769 = vmatprep.subr.mxu0 %v937_v0 }
  0x60   :  { %770 = vmatpush3.msra.mxu0 %v379_v8 }
  0x61   :  { %771 = vmatprep.subr.mxu0 %v937_v0 }
  0x62   :  { %772 = vmatpush3.msra.mxu0 %v378_v9 }
  0x63   :  { %773 = vmatprep.subr.mxu0 %v937_v0 }
  0x64   :  { %774 = vmatpush3.msra.mxu0 %v377_v10 }
  0x65   :  { %775 = vmatprep.subr.mxu0 %v937_v0 }
  0x66   :  { %776 = vmatpush3.msra.mxu0 %v376_v11 }
  0x67   :  { %777 = vmatprep.subr.mxu0 %v937_v0 }
  0x68   :  { %778 = vmatpush3.msra.mxu0 %v375_v12 }
  0x69   :  { %779 = vmatprep.subr.mxu0 %v937_v0 }
  0x6a   :  { %780 = vmatpush3.msra.mxu0 %v374_v13 }
  0x6b   :  { %781 = vmatprep.subr.mxu0 %v937_v0 }
  0x6c   :  { %782 = vmatpush3.msra.mxu0 %v373_v14 }
  0x6d   :  { %783 = vmatprep.subr.mxu0 %v937_v0 }
  0x6e   :  { %784 = vmatpush3.msra.mxu0 %v372_v15 }
  0x6f   :  { %785 = vmatprep.subr.mxu0 %v937_v0 }
  0x70   :  { %786 = vmatpush3.msra.mxu0 %v371_v16 }
  0x71   :  { %787 = vmatprep.subr.mxu0 %v937_v0 }
  0x72   :  { %788 = vmatpush3.msra.mxu0 %v370_v17 }
 0x112   :  { %v214_v35 = vpop.f32.mrf.mxu0 }
 0x113   :  { %v215_v36 = vadd.f32 %v609_v34, %v214_v35 }
 0x114   :  { %v721_v37 = vpop.f32.mrf.mxu0 }
 0x115   :  { %v218_v38 = vrot.slane %v215_v36, 4  ;;  %v225_v39 = vmul.f32 %v215_v36, %v215_v36 }
 0x117   :  { %v219_v40 = vadd.f32 %v218_v38, %v215_v36  ;;  %v226_v41 = vrot.slane %v225_v39, 4 }
 0x119   :  { %v220_v42 = vrot.slane %v219_v40, 2  ;;  %v227_v43 = vadd.f32 %v226_v41, %v225_v39 }
 0x11b   :  { %v221_v44 = vadd.f32 %v220_v42, %v219_v40  ;;  %v228_v45 = vrot.slane %v227_v43, 2  ;;  %v613_v42 = vld [vmem:[%s1158_s7] ss:$0 sm:$0xff] }
 0x11d   :  { %v222_v46 = vrot.slane %v221_v44, 1  ;;  %v229_v47 = vadd.f32 %v228_v45, %v227_v43 }
 0x11f   :  { %v223_v48 = vadd.f32 %v222_v46, %v221_v44  ;;  %v230_v49 = vrot.slane %v229_v47, 1  ;;  %v614_v44 = vld [vmem:[%s1159_s8] ss:$0 sm:$0xff] }
 0x121   :  { %v224_v50 = vmul.f32 0.125, %v223_v48  ;;  %v231_v51 = vadd.f32 %v230_v49, %v229_v47  ;;  %v517_v49 = vld [vmem:[#allocation7 + $0x78] sm:$0xff] }
 0x123   :  { %v232_v52 = vmul.f32 0.125, %v231_v51  ;;  %v233_v53 = vmul.f32 %v224_v50, %v224_v50  ;;  %v235_v56 = vsub.f32 %v215_v36, %v224_v50  ;;  %v516_v50 = vld [vmem:[#allocation7 + $0x70] sm:$0xff]  ;;  %v515_v51 = vld [vmem:[#allocation7 + $0x68] sm:$0xff] }
 0x125   :  { %v234_v54 = vsub.f32 %v232_v52, %v233_v53  ;;  %v514_v52 = vld [vmem:[#allocation7 + $0x60] sm:$0xff]  ;;  %v513_v53 = vld [vmem:[#allocation7 + $0x58] sm:$0xff] }
 0x127   :  { %v236_v55 = vadd.f32 1e-05, %v234_v54  ;;  %v512_v54 = vld [vmem:[#allocation7 + $0x50] sm:$0xff] }
 0x129   :  { %835 = vrsqrt.f32 %v236_v55  ;;  %v511_v55 = vld [vmem:[#allocation7 + $0x48] sm:$0xff] }
 0x136   :  { %v836_v57 = vpop.eup %835 }
 0x137   :  { %v238_v59 = vmul.f32 %v836_v57, %v235_v56  ;;  %v510_v56 = vld [vmem:[#allocation7 + $0x40] sm:$0xff]  ;;  %v509_v57 = vld [vmem:[#allocation7 + $0x38] sm:$0xff] }
 0x139   :  { %v245_v61 = vmul.f32 %v610_v58, %v238_v59  ;;  %v508_v58 = vld [vmem:[#allocation7 + $0x30] sm:$0xff]  ;;  %v507_v59 = vld [vmem:[#allocation7 + $0x28] sm:$0xff] }
 0x13b   :  { %v252_v62 = vadd.f32 %v611_v60, %v245_v61  ;;  %v506_v60 = vld [vmem:[#allocation7 + $0x20] sm:$0xff]  ;;  %v505_v61 = vld [vmem:[#allocation7 + $0x18] sm:$0xff] }
 0x13d   :  { %v253_v63 = vmul.f32 0.01, %v252_v62 }
 0x13f   :  { %v254_v1 = vmax.f32 %v252_v62, %v253_v63  ;;  %v504_v62 = vld [vmem:[#allocation7 + $0x10] sm:$0xff]  ;;  %v503_v63 = vld [vmem:[#allocation7 + $0x8] sm:$0xff] }
 0x141   :  { %755 = vmatmul.mubr.f32.vlgmr.msra.gmra.mxu1 %v254_v1  ;;  %v502_v1 = vld [vmem:[#allocation7] sm:$0xff] }
 0x142   :  { %824 = vmatprep.mubr.msk.f32.mxu1 %vm938_vm0, %v937_v0  ;;  %793 = vmatpush3.msra.mxu1 %v517_v49 }
 0x143   :  { %794 = vmatprep.subr.mxu1 %v937_v0 }
 0x144   :  { %795 = vmatpush3.msra.mxu1 %v516_v50 }
 0x145   :  { %796 = vmatprep.subr.mxu1 %v937_v0 }
 0x146   :  { %797 = vmatpush3.msra.mxu1 %v515_v51 }
 0x147   :  { %798 = vmatprep.subr.mxu1 %v937_v0 }
 0x148   :  { %799 = vmatpush3.msra.mxu1 %v514_v52 }
 0x149   :  { %800 = vmatprep.subr.mxu1 %v937_v0 }
 0x14a   :  { %801 = vmatpush3.msra.mxu1 %v513_v53 }
 0x14b   :  { %802 = vmatprep.subr.mxu1 %v937_v0 }
 0x14c   :  { %803 = vmatpush3.msra.mxu1 %v512_v54 }
 0x14d   :  { %804 = vmatprep.subr.mxu1 %v937_v0 }
 0x14e   :  { %805 = vmatpush3.msra.mxu1 %v511_v55 }
 0x14f   :  { %806 = vmatprep.subr.mxu1 %v937_v0 }
 0x150   :  { %807 = vmatpush3.msra.mxu1 %v510_v56 }
 0x151   :  { %808 = vmatprep.subr.mxu1 %v937_v0 }
 0x152   :  { %809 = vmatpush3.msra.mxu1 %v509_v57 }
 0x153   :  { %810 = vmatprep.subr.mxu1 %v937_v0 }
 0x154   :  { %811 = vmatpush3.msra.mxu1 %v508_v58 }
 0x155   :  { %812 = vmatprep.subr.mxu1 %v937_v0 }
 0x156   :  { %813 = vmatpush3.msra.mxu1 %v507_v59 }
 0x157   :  { %814 = vmatprep.subr.mxu1 %v937_v0 }
 0x158   :  { %815 = vmatpush3.msra.mxu1 %v506_v60 }
 0x159   :  { %816 = vmatprep.subr.mxu1 %v937_v0 }
 0x15a   :  { %817 = vmatpush3.msra.mxu1 %v505_v61 }
 0x15b   :  { %818 = vmatprep.subr.mxu1 %v937_v0 }
 0x15c   :  { %819 = vmatpush3.msra.mxu1 %v504_v62 }
 0x15d   :  { %820 = vmatprep.subr.mxu1 %v937_v0 }
 0x15e   :  { %821 = vmatpush3.msra.mxu1 %v503_v63 }
 0x15f   :  { %822 = vmatprep.subr.mxu1 %v937_v0 }
 0x160   :  { %823 = vmatpush3.msra.mxu1 %v502_v1 }
 0x201   :  { %v327_v19 = vpop.f32.mrf.mxu1 }
 0x202   :  { %v328_v20 = vadd.f32 %v612_v18, %v327_v19 }
 0x203   :  { %v756_v21 = vpop.f32.mrf.mxu1 }
 0x204   :  { %v333_v22 = vrot.slane %v328_v20, 4  ;;  %v340_v23 = vmul.f32 %v328_v20, %v328_v20 }
 0x206   :  { %v334_v24 = vadd.f32 %v333_v22, %v328_v20  ;;  %v341_v25 = vrot.slane %v340_v23, 4 }
 0x208   :  { %v335_v26 = vrot.slane %v334_v24, 2  ;;  %v342_v27 = vadd.f32 %v341_v25, %v340_v23  ;;  %v616_v25 = vld [vmem:[%s1162_s11] ss:$0 sm:$0xff] }
 0x20a   :  { %v336_v28 = vadd.f32 %v335_v26, %v334_v24  ;;  %v343_v29 = vrot.slane %v342_v27, 2 }
 0x20c   :  { %v337_v30 = vrot.slane %v336_v28, 1  ;;  %v344_v31 = vadd.f32 %v343_v29, %v342_v27  ;;  %v617_v27 = vld [vmem:[%s1163_s12] ss:$0 sm:$0xff] }
 0x20e   :  { %v338_v32 = vadd.f32 %v337_v30, %v336_v28  ;;  %v345_v33 = vrot.slane %v344_v31, 1 }
 0x210   :  { %v339_v34 = vmul.f32 0.125, %v338_v32  ;;  %v346_v35 = vadd.f32 %v345_v33, %v344_v31  ;;  %v618_v32 = vld [vmem:[%s1165_s14] ss:$0 sm:$0xff] }
 0x212   :  { %v347_v36 = vmul.f32 0.125, %v346_v35  ;;  %v348_v37 = vmul.f32 %v339_v34, %v339_v34  ;;  %v350_v40 = vsub.f32 %v328_v20, %v339_v34 }
 0x214   :  { %v349_v38 = vsub.f32 %v347_v36, %v348_v37 }
 0x216   :  { %v351_v39 = vadd.f32 1e-05, %v349_v38 }
 0x218   :  { %837 = vrsqrt.f32 %v351_v39 }
 0x225   :  { %v838_v41 = vpop.eup %837 }
 0x226   :  { %v353_v43 = vmul.f32 %v838_v41, %v350_v40 }
 0x228   :  { %v360_v45 = vmul.f32 %v613_v42, %v353_v43 }
 0x22a   :  { %v367_v46 = vadd.f32 %v614_v44, %v360_v45 }
 0x22c   :  { %v368_v47 = vmul.f32 0.01, %v367_v46 }
 0x22e   :  { %v369_v48 = vmax.f32 %v367_v46, %v368_v47 }
 0x230   :  { %790 = vmatmul.mubr.f32.vlgmr.msra.gmra.mxu0 %v369_v48 }
 0x2f0   :  { %v459_v3 = vpop.f32.mrf.mxu0 }
 0x2f1   :  { %v460_v4 = vadd.f32 %v615_v2, %v459_v3 }
 0x2f2   :  { %v791_v5 = vpop.f32.mrf.mxu0 }
 0x2f3   :  { %v465_v6 = vrot.slane %v460_v4, 4  ;;  %v472_v7 = vmul.f32 %v460_v4, %v460_v4 }
 0x2f5   :  { %v466_v8 = vadd.f32 %v465_v6, %v460_v4  ;;  %v473_v9 = vrot.slane %v472_v7, 4 }
 0x2f7   :  { %v467_v10 = vrot.slane %v466_v8, 2  ;;  %v474_v11 = vadd.f32 %v473_v9, %v472_v7 }
 0x2f9   :  { %v468_v12 = vadd.f32 %v467_v10, %v466_v8  ;;  %v475_v13 = vrot.slane %v474_v11, 2 }
 0x2fb   :  { %v469_v14 = vrot.slane %v468_v12, 1  ;;  %v476_v15 = vadd.f32 %v475_v13, %v474_v11 }
 0x2fd   :  { %v470_v16 = vadd.f32 %v469_v14, %v468_v12  ;;  %v477_v0 = vrot.slane %v476_v15, 1 }
 0x2ff   :  { %v471_v17 = vmul.f32 0.125, %v470_v16  ;;  %v478_v18 = vadd.f32 %v477_v0, %v476_v15 }
 0x301   :  { %v479_v19 = vmul.f32 0.125, %v478_v18  ;;  %v480_v20 = vmul.f32 %v471_v17, %v471_v17  ;;  %v482_v23 = vsub.f32 %v460_v4, %v471_v17 }
 0x303   :  { %v481_v21 = vsub.f32 %v479_v19, %v480_v20 }
 0x305   :  { %v483_v22 = vadd.f32 1e-05, %v481_v21 }
 0x307   :  { %839 = vrsqrt.f32 %v483_v22 }
 0x314   :  { %v840_v24 = vpop.eup %839 }
 0x315   :  { %v485_v26 = vmul.f32 %v840_v24, %v482_v23 }
 0x317   :  { %v492_v28 = vmul.f32 %v616_v25, %v485_v26 }
 0x319   :  { %v499_v29 = vadd.f32 %v617_v27, %v492_v28 }
 0x31b   :  { %v500_v30 = vmul.f32 0.01, %v499_v29 }
 0x31d   :  { %v501_v31 = vmax.f32 %v499_v29, %v500_v30 }
 0x31f   :  { %825 = vmatmul.mubr.f32.vlgmr.msra.gmra.mxu1 %v501_v31 }
 0x3df   :  { %v591_v33 = vpop.f32.mrf.mxu1 }
 0x3e0   :  { %v592_v34 = vadd.f32 %v618_v32, %v591_v33 }
 0x3e1   :  { %v826_v35 = vpop.f32.mrf.mxu1 }
 0x3e2   :  { %v595_v36 = vsub.f32 0.0, %v592_v34 }
 0x3e4   :  { %v596_v37 = vmul.f32 1.442695, %v595_v36 }
 0x3e6   :  { %841 = vpow2.f32 %v596_v37 }
 0x3f3   :  { %v842_v38 = vpop.eup %841 }
 0x3f4   :  { %v598_v39 = vadd.f32 1.0, %v842_v38 }
 0x3f6   :  { %843 = vrcp.f32 %v598_v39 }
 0x403   :  { %v844_v40 = vpop.eup %843 }
 0x404   :  { %601 = vst [vmem:[%s1166_s15] sm:$0xff] %v844_v40 }
 0x405   :  { %606 = vsyncpa [#allocation3], 1 }
 0x406   :  { %607 = vsyncpa [#allocation5], 1 }
 0x407   :  { %608 = vsyncpa [#allocation8], 1 }

</bundles_post_ra>
